<compile_context>
chip_gen: v6e
topology: v6e:2x2x1
jax: 0.10.0
libtpu: 0.0.40
codegen_flags: <defaults>
</compile_context>

<pallas_src>
import math

import jax
import jax.numpy as jnp
from jax.experimental import pallas as pl
from jax.experimental.pallas import tpu as pltpu


def _unet_up_kernel(x2_ref, x1_ref, w_ref, b_ref, o_ref):
    """Fused ConvTranspose2d(kernel=2, stride=2) + channel-concat kernel.

    x2_ref: (1, th*W, Cin)         flattened low-res pixels of `th` input rows
    x1_ref: (1, th, 2, W, 2*C1)    skip connection, viewed (2H -> H,2), (2W -> W,2)
    w_ref : (Cin, 4*Cout)          deconv weight, column index = (ki*2 + kj)*Cout + co
    b_ref : (1, 4*Cout)            bias tiled over the 4 taps
    o_ref : (1, th, 2, W, 2*Ctot)  output view of NHWC (N, 2H, 2W, C1+Cout)
    """
    th = x1_ref.shape[1]
    W = x1_ref.shape[3]
    C1 = x1_ref.shape[4] // 2
    Cout = w_ref.shape[1] // 4
    Ctot = C1 + Cout

    # One MXU matmul produces all four taps of every pixel in the row block.
    x = x2_ref[0]                                                  # (th*W, Cin)
    y = jnp.dot(x, w_ref[...], preferred_element_type=jnp.float32) + b_ref[...]
    y = y.reshape(th, W, 4 * Cout).astype(o_ref.dtype)             # sublane-only split

    # Fused concat: skip connection -> channels [0:C1] of every output pixel.
    x1 = x1_ref[0].astype(o_ref.dtype)                             # (th, 2, W, 2*C1)
    for kj in range(2):
        o_ref[0, :, :, :, kj * Ctot:kj * Ctot + C1] = x1[:, :, :, kj * C1:(kj + 1) * C1]

    # Fused 2x2 scatter: tap (ki, kj) -> output pixel (2i+ki, 2j+kj), channels [C1:Ctot].
    for ki in range(2):
        for kj in range(2):
            t = ki * 2 + kj
            o_ref[0, :, ki, :, kj * Ctot + C1:(kj + 1) * Ctot] = (
                y[:, :, t * Cout:(t + 1) * Cout])


def _choose_row_tile(H, W, Cin, C1, Cout, x2_bytes, o_bytes,
                     *, budget_bytes=16 << 20, target_rows=1024):
    """Largest divisor `th` of H such that:
       (a) th*W matmul rows are near `target_rows` and the double-buffered
           blocks fit in `budget_bytes` of VMEM, and
       (b) the flattened inputs2 block (th*W, Cin) keeps its second-to-last
           dim a multiple of 8 (the (8,128) BlockSpec rule) unless th == H.
    """
    Ctot = C1 + Cout
    per_row = 2 * (W * Cin * x2_bytes          # inputs2 block (double-buffered)
                   + 4 * W * C1 * o_bytes      # skip-connection block
                   + 4 * W * Ctot * o_bytes)   # output block
    max_th = max(1, budget_bytes // max(per_row, 1))
    th_target = max(1, min(max_th, pl.cdiv(target_rows, W)))
    need_mult = 8 // math.gcd(W, 8)            # th*W % 8 == 0  <=>  th % need_mult == 0
    th = None
    for d in range(1, H + 1):
        if H % d == 0 and d <= th_target and d % need_mult == 0:
            th = d
    if th is None:
        th = H   # full-H block always satisfies the layout constraint
    return th


def unet_up_forward_nhwc(inputs1_nhwc, inputs2_nhwc, weight, bias,
                         *, compute_dtype=None):
    """Effective unetUp.forward in NHWC:
       concat([inputs1, ConvTranspose2d_{k=2,s=2}(inputs2)], axis=-1).

    Preferred entry point: keeping the surrounding model in NHWC avoids any
    NCHW<->NHWC transposes around this fully fused kernel.
    NOTE: for very small Cin (< ~128) the MXU is underutilized and plain XLA
    may be as fast; the kernel is still correct there.
    """
    N, H, W, Cin = inputs2_nhwc.shape
    N1, H1, W1, C1 = inputs1_nhwc.shape
    if N1 != N or H1 != 2 * H or W1 != 2 * W:
        raise ValueError(
            f"inputs1 {inputs1_nhwc.shape} incompatible with 2x-upsampled "
            f"inputs2 {inputs2_nhwc.shape}")
    Cin_w, Cout, KH, KW = weight.shape
    if Cin_w != Cin or KH != 2 or KW != 2:
        raise ValueError(f"weight shape {weight.shape} != ({Cin}, Cout, 2, 2)")
    Ctot = C1 + Cout
    out_dtype = inputs1_nhwc.dtype

    # Weight (Cin, Cout, 2, 2) -> (Cin, 4*Cout); column = (ki*2 + kj)*Cout + co.
    w_flat = jnp.transpose(weight, (0, 2, 3, 1)).reshape(Cin, 4 * Cout)
    b_flat = jnp.tile(bias, 4).reshape(1, 4 * Cout).astype(jnp.float32)
    x2 = inputs2_nhwc
    if compute_dtype is not None:
        w_flat = w_flat.astype(compute_dtype)
        x2 = x2.astype(compute_dtype)

    # Free (row-major) reinterpretations -- no HBM data movement:
    x2_flat = x2.reshape(N, H * W, Cin)                  # pixels -> matmul rows
    x1_view = inputs1_nhwc.reshape(N, H, 2, W, 2 * C1)   # (2H, 2W) -> (H, 2, W, 2)

    x2_bytes = x2.dtype.itemsize
    x1_bytes = inputs1_nhwc.dtype.itemsize
    o_bytes = jnp.zeros((), out_dtype).dtype.itemsize
    th = _choose_row_tile(H, W, Cin, C1, Cout, x2_bytes, o_bytes)
    grid = (N, H // th)

    # Explicit VMEM budget: double-buffered blocks + weights/bias buffers,
    # plus headroom.  Stays well under v7x's 64 MiB for these tile sizes.
    block_bytes = (th * W * Cin * x2_bytes
                   + th * 2 * W * 2 * C1 * x1_bytes
                   + th * 2 * W * 2 * Ctot * o_bytes)
    w_bytes = (Cin * 4 * Cout + 4 * Cout) * w_flat.dtype.itemsize
    vmem_limit = int(max(2 * block_bytes + 2 * w_bytes + (8 << 20), 32 << 20))

    cost = pl.CostEstimate(
        flops=2 * N * H * W * Cin * 4 * Cout,
        transcendentals=0,
        bytes_accessed=(N * H * W * Cin * x2_bytes
                        + N * 4 * H * W * C1 * x1_bytes
                        + N * 4 * H * W * Ctot * o_bytes
                        + Cin * 4 * Cout * w_flat.dtype.itemsize),
    )

    out_view = pl.pallas_call(
        _unet_up_kernel,
        out_shape=jax.ShapeDtypeStruct((N, H, 2, W, 2 * Ctot), out_dtype),
        grid_spec=pltpu.PrefetchScalarGridSpec(
            num_scalar_prefetch=0,
            grid=grid,
            in_specs=[
                pl.BlockSpec((1, th * W, Cin), lambda n, i: (n, i, 0)),
                pl.BlockSpec((1, th, 2, W, 2 * C1), lambda n, i: (n, i, 0, 0, 0)),
                pl.BlockSpec((Cin, 4 * Cout), lambda n, i: (0, 0)),
                pl.BlockSpec((1, 4 * Cout), lambda n, i: (0, 0)),
            ],
            out_specs=pl.BlockSpec((1, th, 2, W, 2 * Ctot),
                                   lambda n, i: (n, i, 0, 0, 0)),
        ),
        compiler_params=pltpu.CompilerParams(
            dimension_semantics=("parallel", "parallel"),
            vmem_limit_bytes=vmem_limit,
        ),
        cost_estimate=cost,
    )(x2_flat, x1_view, w_flat, b_flat)

    # Free reinterpretation back to NHWC.
    return out_view.reshape(N, 2 * H, 2 * W, Ctot)


def unet_up_forward(inputs1_nchw, inputs2_nchw, weight, bias, *, compute_dtype=None):
    """PyTorch-layout wrapper: NCHW in / NCHW out (matches unetUp.forward).

    The boundary transposes are extra HBM passes; for best performance keep the
    surrounding model in NHWC and call `unet_up_forward_nhwc` directly.
    """
    x1 = jnp.transpose(inputs1_nchw, (0, 2, 3, 1))
    x2 = jnp.transpose(inputs2_nchw, (0, 2, 3, 1))
    out = unet_up_forward_nhwc(x1, x2, weight, bias, compute_dtype=compute_dtype)
    return jnp.transpose(out, (0, 3, 1, 2))


def _reference_forward(inputs1, inputs2, weight, bias):
    """Pure-jnp NCHW reference (independent of the kernel's flattening)."""
    N, Cin, H, W = inputs2.shape
    Cout = weight.shape[1]
    # out[n, co, 2i+ki, 2j+kj] = sum_ci x2[n,ci,i,j] * W[ci,co,ki,kj] + b[co]
    y = jnp.einsum("nchw,cokl->nohkwl", inputs2, weight,
                   precision=jax.lax.Precision.HIGHEST)
    y = y.reshape(N, Cout, 2 * H, 2 * W) + bias[None, :, None, None]
    return jnp.concatenate([inputs1, y], axis=1)


if __name__ == "__main__":
    key = jax.random.PRNGKey(0)

    def run_case(in_size, out_size, N, H2, W2, case_key):
        k1, k2, k3, k4 = jax.random.split(case_key, 4)
        # Typical UNet usage: skip connection `inputs1` carries out_size
        # channels at the upsampled resolution.
        inputs1 = jax.random.normal(k1, (N, out_size, 2 * H2, 2 * W2), jnp.float32)
        inputs2 = jax.random.normal(k2, (N, in_size, H2, W2), jnp.float32)
        up_w = 0.1 * jax.random.normal(k3, (in_size, out_size, 2, 2), jnp.float32)
        up_b = 0.1 * jax.random.normal(k4, (out_size,), jnp.float32)

        out = jax.jit(unet_up_forward)(inputs1, inputs2, up_w, up_b)
        out = jax.block_until_ready(out)

        ref = _reference_forward(inputs1, inputs2, up_w, up_b)
        assert out.shape == (N, out_size + out_size, 2 * H2, 2 * W2), out.shape
        err = float(jnp.max(jnp.abs(out - ref)))
        assert jnp.allclose(out, ref, rtol=1e-4, atol=1e-4), f"mismatch: max|err|={err}"

    # unetUp(in_size=4, out_size=2, is_deconv=True)
    run_case(in_size=4, out_size=2, N=2, H2=8, W2=8,
             case_key=jax.random.fold_in(key, 0))
    # A slightly wider case to exercise lane-dense channel slices / tiling.
    run_case(in_size=32, out_size=16, N=2, H2=8, W2=8,
             case_key=jax.random.fold_in(key, 1))

    print("KERNEL_OK")
</pallas_src>

<mosaic_0001>
module attributes {stable_mosaic.version = 11 : i64} {
  func.func @_unet_up_kernel(%arg0: i32, %arg1: i32, %arg2: memref<1x64x4xf32, #tpu.memory_space<vmem>>, %arg3: memref<1x8x2x8x4xf32, #tpu.memory_space<vmem>>, %arg4: memref<4x8xf32, #tpu.memory_space<vmem>>, %arg5: memref<1x8xf32, #tpu.memory_space<vmem>>, %arg6: memref<1x8x2x8x8xf32, #tpu.memory_space<vmem>>) attributes {dimension_semantics = [#tpu.dimension_semantics<parallel>, #tpu.dimension_semantics<parallel>], iteration_bounds = array<i64: 2, 1>, scalar_prefetch = 0 : i64, scratch_operands = 0 : i64, tpu.core_type = #tpu.core_type<tc>, window_params = [{transform_indices = @transform_0, window_bounds = array<i64: 1, 64, 4>}, {transform_indices = @transform_1, window_bounds = array<i64: 1, 8, 2, 8, 4>}, {pipeline_mode = #tpu.pipeline_mode<synchronous>, transform_indices = @transform_2, window_bounds = array<i64: 4, 8>}, {pipeline_mode = #tpu.pipeline_mode<synchronous>, transform_indices = @transform_3, window_bounds = array<i64: 1, 8>}, {transform_indices = @transform_4, window_bounds = array<i64: 1, 8, 2, 8, 8>}]} {
    %c0 = arith.constant 0 : index
    %c0_0 = arith.constant 0 : index
    %c0_1 = arith.constant 0 : index
    %0 = vector.load %arg2[%c0, %c0_0, %c0_1] : memref<1x64x4xf32, #tpu.memory_space<vmem>>, vector<1x64x4xf32>
    %1 = vector.shape_cast %0 : vector<1x64x4xf32> to vector<64x4xf32>
    %c0_2 = arith.constant 0 : index
    %c0_3 = arith.constant 0 : index
    %2 = vector.load %arg4[%c0_2, %c0_3] : memref<4x8xf32, #tpu.memory_space<vmem>>, vector<4x8xf32>
    %cst = arith.constant dense<0.000000e+00> : vector<64x8xf32>
    %3 = tpu.matmul %1, %2, %cst {dimension_numbers = #tpu.dot_dimension_numbers<[1], [0], [0], [1], [0, 0, 1, 1], [], []>} : vector<64x4xf32>, vector<4x8xf32>, vector<64x8xf32> -> vector<64x8xf32>
    %c0_4 = arith.constant 0 : index
    %c0_5 = arith.constant 0 : index
    %4 = vector.load %arg5[%c0_4, %c0_5] : memref<1x8xf32, #tpu.memory_space<vmem>>, vector<1x8xf32>
    %5 = vector.broadcast %4 : vector<1x8xf32> to vector<64x8xf32>
    %6 = arith.addf %3, %5 : vector<64x8xf32>
    %7 = vector.shape_cast %6 : vector<64x8xf32> to vector<8x8x8xf32>
    %c0_6 = arith.constant 0 : index
    %c0_7 = arith.constant 0 : index
    %c0_8 = arith.constant 0 : index
    %c0_9 = arith.constant 0 : index
    %c0_10 = arith.constant 0 : index
    %8 = vector.load %arg3[%c0_6, %c0_7, %c0_8, %c0_9, %c0_10] : memref<1x8x2x8x4xf32, #tpu.memory_space<vmem>>, vector<1x8x2x8x4xf32>
    %9 = vector.shape_cast %8 : vector<1x8x2x8x4xf32> to vector<8x2x8x4xf32>
    %10 = vector.extract_strided_slice %9 {offsets = [0, 0, 0, 0], sizes = [8, 2, 8, 2], strides = [1, 1, 1, 1]} : vector<8x2x8x4xf32> to vector<8x2x8x2xf32>
    %c0_11 = arith.constant 0 : index
    %c0_12 = arith.constant 0 : index
    %c0_13 = arith.constant 0 : index
    %c0_14 = arith.constant 0 : index
    %c0_15 = arith.constant 0 : index
    %11 = vector.load %arg6[%c0_11, %c0_12, %c0_13, %c0_14, %c0_15] : memref<1x8x2x8x8xf32, #tpu.memory_space<vmem>>, vector<1x8x2x8x2xf32>
    %12 = vector.shape_cast %11 : vector<1x8x2x8x2xf32> to vector<8x2x8x2xf32>
    %13 = vector.shape_cast %10 : vector<8x2x8x2xf32> to vector<1x8x2x8x2xf32>
    tpu.vector_store %arg6[%c0_11, %c0_12, %c0_13, %c0_14, %c0_15], %13 {strides = array<i32>} : memref<1x8x2x8x8xf32, #tpu.memory_space<vmem>>, vector<1x8x2x8x2xf32>,
    %14 = vector.extract_strided_slice %9 {offsets = [0, 0, 0, 2], sizes = [8, 2, 8, 2], strides = [1, 1, 1, 1]} : vector<8x2x8x4xf32> to vector<8x2x8x2xf32>
    %c0_16 = arith.constant 0 : index
    %c0_17 = arith.constant 0 : index
    %c0_18 = arith.constant 0 : index
    %c0_19 = arith.constant 0 : index
    %c4 = arith.constant 4 : index
    %15 = vector.load %arg6[%c0_16, %c0_17, %c0_18, %c0_19, %c4] : memref<1x8x2x8x8xf32, #tpu.memory_space<vmem>>, vector<1x8x2x8x2xf32>
    %16 = vector.shape_cast %15 : vector<1x8x2x8x2xf32> to vector<8x2x8x2xf32>
    %17 = vector.shape_cast %14 : vector<8x2x8x2xf32> to vector<1x8x2x8x2xf32>
    tpu.vector_store %arg6[%c0_16, %c0_17, %c0_18, %c0_19, %c4], %17 {strides = array<i32>} : memref<1x8x2x8x8xf32, #tpu.memory_space<vmem>>, vector<1x8x2x8x2xf32>,
    %18 = vector.extract_strided_slice %7 {offsets = [0, 0, 0], sizes = [8, 8, 2], strides = [1, 1, 1]} : vector<8x8x8xf32> to vector<8x8x2xf32>
    %c0_20 = arith.constant 0 : index
    %c0_21 = arith.constant 0 : index
    %c0_22 = arith.constant 0 : index
    %c0_23 = arith.constant 0 : index
    %c2 = arith.constant 2 : index
    %19 = vector.load %arg6[%c0_20, %c0_21, %c0_22, %c0_23, %c2] : memref<1x8x2x8x8xf32, #tpu.memory_space<vmem>>, vector<1x8x1x8x2xf32>
    %20 = vector.shape_cast %19 : vector<1x8x1x8x2xf32> to vector<8x8x2xf32>
    %21 = vector.shape_cast %18 : vector<8x8x2xf32> to vector<1x8x1x8x2xf32>
    tpu.vector_store %arg6[%c0_20, %c0_21, %c0_22, %c0_23, %c2], %21 {strides = array<i32>} : memref<1x8x2x8x8xf32, #tpu.memory_space<vmem>>, vector<1x8x1x8x2xf32>,
    %22 = vector.extract_strided_slice %7 {offsets = [0, 0, 2], sizes = [8, 8, 2], strides = [1, 1, 1]} : vector<8x8x8xf32> to vector<8x8x2xf32>
    %c0_24 = arith.constant 0 : index
    %c0_25 = arith.constant 0 : index
    %c0_26 = arith.constant 0 : index
    %c0_27 = arith.constant 0 : index
    %c6 = arith.constant 6 : index
    %23 = vector.load %arg6[%c0_24, %c0_25, %c0_26, %c0_27, %c6] : memref<1x8x2x8x8xf32, #tpu.memory_space<vmem>>, vector<1x8x1x8x2xf32>
    %24 = vector.shape_cast %23 : vector<1x8x1x8x2xf32> to vector<8x8x2xf32>
    %25 = vector.shape_cast %22 : vector<8x8x2xf32> to vector<1x8x1x8x2xf32>
    tpu.vector_store %arg6[%c0_24, %c0_25, %c0_26, %c0_27, %c6], %25 {strides = array<i32>} : memref<1x8x2x8x8xf32, #tpu.memory_space<vmem>>, vector<1x8x1x8x2xf32>,
    %26 = vector.extract_strided_slice %7 {offsets = [0, 0, 4], sizes = [8, 8, 2], strides = [1, 1, 1]} : vector<8x8x8xf32> to vector<8x8x2xf32>
    %c0_28 = arith.constant 0 : index
    %c0_29 = arith.constant 0 : index
    %c1 = arith.constant 1 : index
    %c0_30 = arith.constant 0 : index
    %c2_31 = arith.constant 2 : index
    %27 = vector.load %arg6[%c0_28, %c0_29, %c1, %c0_30, %c2_31] : memref<1x8x2x8x8xf32, #tpu.memory_space<vmem>>, vector<1x8x1x8x2xf32>
    %28 = vector.shape_cast %27 : vector<1x8x1x8x2xf32> to vector<8x8x2xf32>
    %29 = vector.shape_cast %26 : vector<8x8x2xf32> to vector<1x8x1x8x2xf32>
    tpu.vector_store %arg6[%c0_28, %c0_29, %c1, %c0_30, %c2_31], %29 {strides = array<i32>} : memref<1x8x2x8x8xf32, #tpu.memory_space<vmem>>, vector<1x8x1x8x2xf32>,
    %30 = vector.extract_strided_slice %7 {offsets = [0, 0, 6], sizes = [8, 8, 2], strides = [1, 1, 1]} : vector<8x8x8xf32> to vector<8x8x2xf32>
    %c0_32 = arith.constant 0 : index
    %c0_33 = arith.constant 0 : index
    %c1_34 = arith.constant 1 : index
    %c0_35 = arith.constant 0 : index
    %c6_36 = arith.constant 6 : index
    %31 = vector.load %arg6[%c0_32, %c0_33, %c1_34, %c0_35, %c6_36] : memref<1x8x2x8x8xf32, #tpu.memory_space<vmem>>, vector<1x8x1x8x2xf32>
    %32 = vector.shape_cast %31 : vector<1x8x1x8x2xf32> to vector<8x8x2xf32>
    %33 = vector.shape_cast %30 : vector<8x8x2xf32> to vector<1x8x1x8x2xf32>
    tpu.vector_store %arg6[%c0_32, %c0_33, %c1_34, %c0_35, %c6_36], %33 {strides = array<i32>} : memref<1x8x2x8x8xf32, #tpu.memory_space<vmem>>, vector<1x8x1x8x2xf32>,
    return
  }
  func.func @transform_0(%arg0: i32, %arg1: i32) -> (i32, i32, i32) {
    %c0_i32 = arith.constant 0 : i32
    %c0_i32_0 = arith.constant 0 : i32
    return %arg0, %arg1, %c0_i32 : i32, i32, i32
  }
  func.func @transform_1(%arg0: i32, %arg1: i32) -> (i32, i32, i32, i32, i32) {
    %c0_i32 = arith.constant 0 : i32
    %c0_i32_0 = arith.constant 0 : i32
    %c0_i32_1 = arith.constant 0 : i32
    %c0_i32_2 = arith.constant 0 : i32
    return %arg0, %arg1, %c0_i32, %c0_i32_0, %c0_i32_1 : i32, i32, i32, i32, i32
  }
  func.func @transform_2(%arg0: i32, %arg1: i32) -> (i32, i32) {
    %c0_i32 = arith.constant 0 : i32
    %c0_i32_0 = arith.constant 0 : i32
    %c0_i32_1 = arith.constant 0 : i32
    return %c0_i32, %c0_i32_0 : i32, i32
  }
  func.func @transform_3(%arg0: i32, %arg1: i32) -> (i32, i32) {
    %c0_i32 = arith.constant 0 : i32
    %c0_i32_0 = arith.constant 0 : i32
    %c0_i32_1 = arith.constant 0 : i32
    return %c0_i32, %c0_i32_0 : i32, i32
  }
  func.func @transform_4(%arg0: i32, %arg1: i32) -> (i32, i32, i32, i32, i32) {
    %c0_i32 = arith.constant 0 : i32
    %c0_i32_0 = arith.constant 0 : i32
    %c0_i32_1 = arith.constant 0 : i32
    %c0_i32_2 = arith.constant 0 : i32
    return %arg0, %arg1, %c0_i32, %c0_i32_0, %c0_i32_1 : i32, i32, i32, i32, i32
  }
}

</mosaic_0001>

<bundles_post_ra>
// kernel: tile.9
= control target key start
LH: loop header
LB: loop body
LE: loop exit
PB: predicated region body
PF: predicated region fallthrough
CT: control target
= control target key end

     0   :  { %vm8_vm0 = vcmask 15360   ;;  %s40_s8 = smov 2   ;;  %s41_s9 = smov 4   ;;  %vm14_vm1 = vcmask 64560   ;;  %vm20_vm2 = vcmask 48160   ;;  %vm26_vm3 = vcmask 31760   ;;  %s58_s0 = inlined_call_operand.vmem [shape: f32[4,2], index: 0, kind: input, shape index: {}]   ;;  %s59_s1 = inlined_call_operand.vmem [shape: f32[1,8], index: 1, kind: output, shape index: {}]  }
   0x1   :  { %v5_v0 = vld [vmem:[%s58_s0] sm:$0xf]  ;;  %s39_s0 = smov 6  }
   0x2   :  { %6 = vst [vmem:[#allocation1] sm:$0xf] %v5_v0 }
   0x9   :  { %v11_v1 = vld [vmem:[#allocation1 + $0x3] sm:$0x1]   ;;  %v23_v2 = vld [vmem:[#allocation1 + $0x1] sm:$0x1]   ;;  %v7_v3 = vld [vmem:[#allocation1] sm:$0x1]  }
   0xa   :  { %12 = vrot.lane.b32.xlu0 %v11_v1, %s39_s0  ;;  %24 = vrot.lane.b32.xlu1 %v23_v2, %s40_s8  ;;  %v17_v4 = vld [vmem:[#allocation1 + $0x2] sm:$0x1]   ;;  %9 = vst.msk [vmem:[#allocation0] sm:$0x1] %vm8_vm0, %v7_v3  }
   0xe   :  { %18 = vrot.lane.b32.xlu0 %v17_v4, %s41_s9 }
  0x7c   :  { %v13_v5 = vpop.permute.xlu0 %12   ;;  %v25_v6 = vpop.permute.xlu1 %24  }
  0x7d   :  { %15 = vst.msk [vmem:[#allocation0] sm:$0x1] %vm14_vm1, %v13_v5  }
  0x80   :  { %v19_v7 = vpop.permute.xlu0 %18  }
  0x81   :  { %21 = vst.msk [vmem:[#allocation0] sm:$0x1] %vm20_vm2, %v19_v7  }
  0x82   :  { %27 = vst.msk [vmem:[#allocation0] sm:$0x1] %vm26_vm3, %v25_v6  }
  0x89   :  { %v32_v8 = vld [vmem:[#allocation0] sm:$0x1] }
  0x8a   :  { %35 = vst [vmem:[%s59_s1] sm:$0x1] %v32_v8 }

// kernel: tile.8
= control target key start
LH: loop header
LB: loop body
LE: loop exit
PB: predicated region body
PF: predicated region fallthrough
CT: control target
= control target key end

     0   :  { %s22_s0 = inlined_call_operand.vmem [shape: f32[2], index: 0, kind: input, shape index: {}]   ;;  %s23_s1 = inlined_call_operand.vmem [shape: f32[4,2], index: 1, kind: output, shape index: {}]  }
   0x1   :  { %v4_v0 = vld [vmem:[%s22_s0] ss:$0 sm:$0xff] }
   0x2   :  { %5 = vst [vmem:[%s23_s1] sm:$0xf] %v4_v0 }

// kernel: unet_up_forward.1
= control target key start
LH: loop header
LB: loop body
LE: loop exit
PB: predicated region body
PF: predicated region fallthrough
CT: control target
= control target key end

     0   :  { %s917_s15 = smov 0   ;;  %s919_s16 = smov 0   ;;  %s1139_s0 = inlined_call_operand.vmem [shape: f32[2,64,4], index: 0, kind: input, shape index: {}]   ;;  %s1140_s1 = inlined_call_operand.vmem [shape: f32[2,8,2,8,4], index: 1, kind: input, shape index: {}]   ;;  %s1141_s2 = inlined_call_operand.vmem [shape: f32[4,8], index: 2, kind: input, shape index: {}]   ;;  %s1142_s3 = inlined_call_operand.vmem [shape: f32[1,8], index: 3, kind: input, shape index: {}]   ;;  %s1143_s4 = inlined_call_operand.vmem [shape: f32[2,8,2,8,8], index: 4, kind: output, shape index: {}]  }
   0x1   :  { %s921_s17 = smov 0  }
   0x2 LB: > { %s26_s18 = sadd.s32 1, %s883_s16  ;;  %p775_p0 = scmp.ge.s32.totalorder %s887_s17, 1  ;;  %s887_s17 = sphi %s921_s17, %s14_s17   ;;  %s883_s16 = sphi %s919_s16, %s1145_s16   ;;  %s879_s15 = sphi %s917_s15, %s1144_s15  }
   0x3   : > { %p28_p1 = scmp.ge.s32.totalorder %s26_s18, 2  ;;  %p201_p2 = scmp.lt.s32.totalorder %s887_s17, 3 }
   0x5   : > { %s1147_s18 = smov (%p28_p1, %s26_s18), 0  ;;  %p202_p3 = pnand %p775_p0, %p201_p2 }
   0x6   : > { %p247_p4 = scmp.lt.s32.totalorder (!%p202_p3), %s879_s15, 1  ;;  %s889_s6 = smov (!%p202_p3), 2  }
   0x7   : > { %205 = sbr.rel (%p202_p3) target bundleno = 374 (0x176), region = 36  ;;  %s890_s9 = smov (!%p202_p3), 126  }
   0x8   : > { %s891_s10 = smov (!%p202_p3), 4  }
   0xc   : > { %v286_v0 = vld [vmem:[%s1141_s2] sm:$0xf]  ;;  %vm319_vm0 = vcmask 1043456   ;;  %s1149_s15 = smov (!%p247_p4, %s879_s15), 1  ;;  %vm294_vm1 = vcmask 31744   ;;  %vm444_vm2 = vcmask 15360  }
   0xd   : > { %822 = vmatprep.subr.msk.mxu0 %vm319_vm0, %v286_v0  ;;  %836 = vmatprep.subr.msk.mxu1 %vm319_vm0, %v286_v0  ;;  %s810_s21 = sshll.u32 %s1149_s15, 6  ;;  %s811_s22 = sshll.u32 %s1149_s15, 7  ;;  %vm525_vm3 = vcmask 48160   ;;  %v782_v41 = vld [vmem:[%s1142_s3] ss:$0 sm:$0xff]  ;;  %vm574_vm4 = vcmask 31760  }
   0xe   : > { %823 = vmatpush3.msk.msra.mxu0 %vm319_vm0, %v286_v0  ;;  %837 = vmatpush3.msk.msra.mxu1 %vm319_vm0, %v286_v0  ;;  %s254_s25 = scalar_lea.vmem %s1139_s0, %s810_s21  ;;  %s944_s28 = scalar_lea.vmem %s1140_s1, %s811_s22  ;;  %vm607_vm5 = vcmask 64560  }
   0xf   : > { %s949_s5 = scalar_lea.vmem %s1143_s4, %s811_s22  ;;  %v278_v1 = vld [vmem:[%s254_s25] sm:$0xff]  ;;  %v279_v2 = vld [vmem:[%s254_s25 + $0x8] sm:$0xff]  ;;  %v280_v5 = vld [vmem:[%s254_s25 + $0x10] sm:$0xff] }
  0x10   : > { %v282_v3 = vld [vmem:[%s254_s25 + $0x20] sm:$0xff]  ;;  %824 = vmatprep.mubr.msk.f32.mxu0 %vm294_vm1, %v278_v1  ;;  %v283_v4 = vld [vmem:[%s254_s25 + $0x28] sm:$0xff]  ;;  %v281_v6 = vld [vmem:[%s254_s25 + $0x18] sm:$0xff] }
  0x11   : > { %830 = vmatprep.mubr.msk.f32.mxu1 %vm294_vm1, %v282_v3  ;;  %825 = vmatmul.mubr.msk.f32.vlgmr.msra.gmra.mxu0 %vm294_vm1, %v279_v2  ;;  %v284_v7 = vld [vmem:[%s254_s25 + $0x30] sm:$0xff]  ;;  %v285_v8 = vld [vmem:[%s254_s25 + $0x38] sm:$0xff]  ;;  %v428_v10 = vld [vmem:[%s944_s28] sm:$0xff] }
  0x12   : > { %831 = vmatmul.mubr.msk.f32.vlgmr.msra.gmra.mxu1 %vm294_vm1, %v283_v4  ;;  %v430_v9 = vld [vmem:[%s944_s28 + $0x10] sm:$0xff]  ;;  %827 = vmatprep.mubr.msk.f32.mxu0 %vm294_vm1, %v280_v5  ;;  %v431_v11 = vld [vmem:[%s944_s28 + $0x18] sm:$0xff]  ;;  %v429_v12 = vld [vmem:[%s944_s28 + $0x8] sm:$0xff]  ;;  %445 = vst.msk [vmem:[%s949_s5] sm:$0xff] %vm444_vm2, %v428_v10 }
  0x13   : > { %833 = vmatprep.mubr.msk.f32.mxu1 %vm294_vm1, %v284_v7  ;;  %447 = vst.msk [vmem:[%s949_s5 + $0x10] sm:$0xff] %vm444_vm2, %v430_v9  ;;  %481 = vrot.lane.b32.xlu1 %v430_v9, %s889_s6  ;;  %448 = vst.msk [vmem:[%s949_s5 + $0x18] sm:$0xff] %vm444_vm2, %v431_v11  ;;  %v433_v13 = vld [vmem:[%s944_s28 + $0x28] sm:$0xff] }
  0x14   : > { %477 = vrot.lane.b32.xlu0 %v428_v10, %s889_s6  ;;  %446 = vst.msk [vmem:[%s949_s5 + $0x8] sm:$0xff] %vm444_vm2, %v429_v12  ;;  %v432_v14 = vld [vmem:[%s944_s28 + $0x20] sm:$0xff]  ;;  %450 = vst.msk [vmem:[%s949_s5 + $0x28] sm:$0xff] %vm444_vm2, %v433_v13 }
  0x15   : > { %449 = vst.msk [vmem:[%s949_s5 + $0x20] sm:$0xff] %vm444_vm2, %v432_v14  ;;  %v435_v15 = vld [vmem:[%s944_s28 + $0x38] sm:$0xff]  ;;  %v434_v16 = vld [vmem:[%s944_s28 + $0x30] sm:$0xff]  ;;  %v437_v17 = vld [vmem:[%s944_s28 + $0x48] sm:$0xff]  ;;  %828 = vmatmul.mubr.msk.f32.gmra.mxu0 %vm294_vm1, %v281_v6 }
  0x16   : > { %834 = vmatmul.mubr.msk.f32.gmra.mxu1 %vm294_vm1, %v285_v8  ;;  %452 = vst.msk [vmem:[%s949_s5 + $0x38] sm:$0xff] %vm444_vm2, %v435_v15  ;;  %451 = vst.msk [vmem:[%s949_s5 + $0x30] sm:$0xff] %vm444_vm2, %v434_v16  ;;  %v436_v18 = vld [vmem:[%s944_s28 + $0x40] sm:$0xff]  ;;  %v439_v19 = vld [vmem:[%s944_s28 + $0x58] sm:$0xff] }
  0x17   : > { %454 = vst.msk [vmem:[%s949_s5 + $0x48] sm:$0xff] %vm444_vm2, %v437_v17  ;;  %v438_v20 = vld [vmem:[%s944_s28 + $0x50] sm:$0xff]  ;;  %453 = vst.msk [vmem:[%s949_s5 + $0x40] sm:$0xff] %vm444_vm2, %v436_v18  ;;  %v441_v21 = vld [vmem:[%s944_s28 + $0x68] sm:$0xff] }
  0x18   : > { %456 = vst.msk [vmem:[%s949_s5 + $0x58] sm:$0xff] %vm444_vm2, %v439_v19  ;;  %455 = vst.msk [vmem:[%s949_s5 + $0x50] sm:$0xff] %vm444_vm2, %v438_v20  ;;  %v440_v22 = vld [vmem:[%s944_s28 + $0x60] sm:$0xff]  ;;  %v443_v23 = vld [vmem:[%s944_s28 + $0x78] sm:$0xff] }
  0x19   : > { %483 = vrot.lane.b32.xlu1 %v431_v11, %s889_s6  ;;  %479 = vrot.lane.b32.xlu0 %v429_v12, %s889_s6  ;;  %458 = vst.msk [vmem:[%s949_s5 + $0x68] sm:$0xff] %vm444_vm2, %v441_v21  ;;  %457 = vst.msk [vmem:[%s949_s5 + $0x60] sm:$0xff] %vm444_vm2, %v440_v22 }
  0x1a   : > { %460 = vst.msk [vmem:[%s949_s5 + $0x78] sm:$0xff] %vm444_vm2, %v443_v23  ;;  %v442_v24 = vld [vmem:[%s944_s28 + $0x70] sm:$0xff] }
  0x1b   : > { %459 = vst.msk [vmem:[%s949_s5 + $0x70] sm:$0xff] %vm444_vm2, %v442_v24 }
  0x1d   : > { %487 = vrot.lane.b32.xlu1 %v433_v13, %s889_s6  ;;  %485 = vrot.lane.b32.xlu0 %v432_v14, %s889_s6 }
  0x21   : > { %491 = vrot.lane.b32.xlu1 %v435_v15, %s889_s6  ;;  %489 = vrot.lane.b32.xlu0 %v434_v16, %s889_s6 }
  0x25   : > { %495 = vrot.lane.b32.xlu1 %v437_v17, %s889_s6  ;;  %493 = vrot.lane.b32.xlu0 %v436_v18, %s889_s6 }
  0x29   : > { %499 = vrot.lane.b32.xlu1 %v439_v19, %s889_s6  ;;  %497 = vrot.lane.b32.xlu0 %v438_v20, %s889_s6 }
  0x2d   : > { %503 = vrot.lane.b32.xlu1 %v441_v21, %s889_s6  ;;  %501 = vrot.lane.b32.xlu0 %v440_v22, %s889_s6 }
  0x31   : > { %507 = vrot.lane.b32.xlu1 %v443_v23, %s889_s6  ;;  %505 = vrot.lane.b32.xlu0 %v442_v24, %s889_s6 }
  0x85   : > { %v482_v25 = vpop.permute.xlu1 %481 }
  0x86   : > { %v478_v26 = vpop.permute.xlu0 %477  ;;  %528 = vst.msk [vmem:[%s949_s5 + $0x10] sm:$0xff] %vm525_vm3, %v482_v25 }
  0x87   : > { %526 = vst.msk [vmem:[%s949_s5] sm:$0xff] %vm525_vm3, %v478_v26 }
  0x8b   : > { %v484_v27 = vpop.permute.xlu1 %483  ;;  %v480_v28 = vpop.permute.xlu0 %479 }
  0x8c   : > { %529 = vst.msk [vmem:[%s949_s5 + $0x18] sm:$0xff] %vm525_vm3, %v484_v27  ;;  %527 = vst.msk [vmem:[%s949_s5 + $0x8] sm:$0xff] %vm525_vm3, %v480_v28 }
  0x8f   : > { %v488_v29 = vpop.permute.xlu1 %487  ;;  %v486_v30 = vpop.permute.xlu0 %485 }
  0x90   : > { %531 = vst.msk [vmem:[%s949_s5 + $0x28] sm:$0xff] %vm525_vm3, %v488_v29  ;;  %530 = vst.msk [vmem:[%s949_s5 + $0x20] sm:$0xff] %vm525_vm3, %v486_v30 }
  0x93   : > { %v492_v31 = vpop.permute.xlu1 %491  ;;  %v490_v32 = vpop.permute.xlu0 %489 }
  0x94   : > { %533 = vst.msk [vmem:[%s949_s5 + $0x38] sm:$0xff] %vm525_vm3, %v492_v31  ;;  %532 = vst.msk [vmem:[%s949_s5 + $0x30] sm:$0xff] %vm525_vm3, %v490_v32 }
  0x97   : > { %v496_v33 = vpop.permute.xlu1 %495  ;;  %v494_v34 = vpop.permute.xlu0 %493 }
  0x98   : > { %535 = vst.msk [vmem:[%s949_s5 + $0x48] sm:$0xff] %vm525_vm3, %v496_v33  ;;  %534 = vst.msk [vmem:[%s949_s5 + $0x40] sm:$0xff] %vm525_vm3, %v494_v34 }
  0x9b   : > { %v500_v35 = vpop.permute.xlu1 %499  ;;  %v498_v36 = vpop.permute.xlu0 %497 }
  0x9c   : > { %537 = vst.msk [vmem:[%s949_s5 + $0x58] sm:$0xff] %vm525_vm3, %v500_v35  ;;  %536 = vst.msk [vmem:[%s949_s5 + $0x50] sm:$0xff] %vm525_vm3, %v498_v36 }
  0x9f   : > { %v504_v37 = vpop.permute.xlu1 %503  ;;  %v502_v38 = vpop.permute.xlu0 %501 }
  0xa0   : > { %539 = vst.msk [vmem:[%s949_s5 + $0x68] sm:$0xff] %vm525_vm3, %v504_v37  ;;  %538 = vst.msk [vmem:[%s949_s5 + $0x60] sm:$0xff] %vm525_vm3, %v502_v38 }
  0xa3   : > { %v508_v39 = vpop.permute.xlu1 %507  ;;  %v506_v40 = vpop.permute.xlu0 %505 }
  0xa4   : > { %541 = vst.msk [vmem:[%s949_s5 + $0x78] sm:$0xff] %vm525_vm3, %v508_v39  ;;  %540 = vst.msk [vmem:[%s949_s5 + $0x70] sm:$0xff] %vm525_vm3, %v506_v40 }
  0xd1   : > { %v826_v42 = vpop.f32.mrf.mxu0 }
  0xd2   : > { %v832_v43 = vpop.f32.mrf.mxu1  ;;  %v395_v44 = vadd.f32 %v826_v42, %v782_v41 }
  0xd3   : > { %v389_v45 = vpop.f32.mrf.mxu0  ;;  %v415_v47 = vadd.f32 %v832_v43, %v782_v41 }
  0xd4   : > { %v390_v46 = vadd.f32 %v782_v41, %v389_v45  ;;  %552 = vrot.lane.b32.xlu1 %v395_v44, %s889_s6  ;;  %v409_v48 = vpop.f32.mrf.mxu1 }
  0xd5   : > { %v410_v49 = vadd.f32 %v782_v41, %v409_v48  ;;  %v829_v50 = vpop.f32.mrf.mxu0 }
  0xd6   : > { %550 = vrot.lane.b32.xlu0 %v390_v46, %s889_s6  ;;  %v405_v51 = vadd.f32 %v829_v50, %v782_v41  ;;  %v835_v53 = vpop.f32.mrf.mxu1 }
  0xd7   : > { %v399_v52 = vpop.f32.mrf.mxu0  ;;  %v425_v55 = vadd.f32 %v835_v53, %v782_v41 }
  0xd8   : > { %560 = vrot.lane.b32.xlu1 %v415_v47, %s889_s6  ;;  %v400_v54 = vadd.f32 %v782_v41, %v399_v52  ;;  %v419_v56 = vpop.f32.mrf.mxu1 }
  0xd9   : > { %v420_v57 = vadd.f32 %v782_v41, %v419_v56 }
  0xda   : > { %558 = vrot.lane.b32.xlu0 %v410_v49, %s889_s6 }
  0xdc   : > { %618 = vrot.lane.b32.xlu1 %v395_v44, %s890_s9 }
  0xde   : > { %616 = vrot.lane.b32.xlu0 %v390_v46, %s890_s9 }
  0xe0   : > { %626 = vrot.lane.b32.xlu1 %v415_v47, %s890_s9 }
  0xe2   : > { %624 = vrot.lane.b32.xlu0 %v410_v49, %s890_s9 }
  0xe4   : > { %585 = vrot.lane.b32.xlu1 %v395_v44, %s891_s10 }
  0xe6   : > { %583 = vrot.lane.b32.xlu0 %v390_v46, %s891_s10 }
  0xe8   : > { %593 = vrot.lane.b32.xlu1 %v415_v47, %s891_s10 }
  0xea   : > { %591 = vrot.lane.b32.xlu0 %v410_v49, %s891_s10 }
  0xec   : > { %556 = vrot.lane.b32.xlu1 %v405_v51, %s889_s6 }
  0xee   : > { %554 = vrot.lane.b32.xlu0 %v400_v54, %s889_s6 }
  0xf0   : > { %564 = vrot.lane.b32.xlu1 %v425_v55, %s889_s6 }
  0xf2   : > { %562 = vrot.lane.b32.xlu0 %v420_v57, %s889_s6 }
  0xf4   : > { %622 = vrot.lane.b32.xlu1 %v405_v51, %s890_s9 }
  0xf6   : > { %620 = vrot.lane.b32.xlu0 %v400_v54, %s890_s9 }
  0xf8   : > { %630 = vrot.lane.b32.xlu1 %v425_v55, %s890_s9 }
  0xfa   : > { %628 = vrot.lane.b32.xlu0 %v420_v57, %s890_s9 }
  0xfc   : > { %589 = vrot.lane.b32.xlu1 %v405_v51, %s891_s10 }
  0xfe   : > { %587 = vrot.lane.b32.xlu0 %v400_v54, %s891_s10 }
 0x100   : > { %597 = vrot.lane.b32.xlu1 %v425_v55, %s891_s10 }
 0x102   : > { %595 = vrot.lane.b32.xlu0 %v420_v57, %s891_s10 }
 0x146   : > { %v553_v58 = vpop.permute.xlu1 %552 }
 0x147   : > { %576 = vst.msk [vmem:[%s949_s5 + $0x10] sm:$0xff] %vm574_vm4, %v553_v58 }
 0x148   : > { %v551_v59 = vpop.permute.xlu0 %550 }
 0x149   : > { %575 = vst.msk [vmem:[%s949_s5] sm:$0xff] %vm574_vm4, %v551_v59 }
 0x14a   : > { %v561_v60 = vpop.permute.xlu1 %560 }
 0x14b   : > { %580 = vst.msk [vmem:[%s949_s5 + $0x50] sm:$0xff] %vm574_vm4, %v561_v60 }
 0x14c   : > { %v559_v61 = vpop.permute.xlu0 %558 }
 0x14d   : > { %579 = vst.msk [vmem:[%s949_s5 + $0x40] sm:$0xff] %vm574_vm4, %v559_v61 }
 0x14e   : > { %v619_v62 = vpop.permute.xlu1 %618 }
 0x14f   : > { %793 = vst.msk [vmem:[%s949_s5 + $0x18] sm:$0xff] %vm574_vm4, %v619_v62 }
 0x150   : > { %801 = vst.msk [vmem:[%s949_s5 + $0x18] sm:$0xff] %vm607_vm5, %v395_v44  ;;  %v617_v63 = vpop.permute.xlu0 %616 }
 0x151   : > { %792 = vst.msk [vmem:[%s949_s5 + $0x8] sm:$0xff] %vm574_vm4, %v617_v63 }
 0x152   : > { %800 = vst.msk [vmem:[%s949_s5 + $0x8] sm:$0xff] %vm607_vm5, %v390_v46  ;;  %v627_v0 = vpop.permute.xlu1 %626 }
 0x153   : > { %797 = vst.msk [vmem:[%s949_s5 + $0x58] sm:$0xff] %vm574_vm4, %v627_v0 }
 0x154   : > { %805 = vst.msk [vmem:[%s949_s5 + $0x58] sm:$0xff] %vm607_vm5, %v415_v47  ;;  %v625_v1 = vpop.permute.xlu0 %624 }
 0x155   : > { %796 = vst.msk [vmem:[%s949_s5 + $0x48] sm:$0xff] %vm574_vm4, %v625_v1 }
 0x156   : > { %804 = vst.msk [vmem:[%s949_s5 + $0x48] sm:$0xff] %vm607_vm5, %v410_v49  ;;  %v586_v2 = vpop.permute.xlu1 %585 }
 0x157   : > { %609 = vst.msk [vmem:[%s949_s5 + $0x10] sm:$0xff] %vm607_vm5, %v586_v2 }
 0x158   : > { %v584_v3 = vpop.permute.xlu0 %583 }
 0x159   : > { %608 = vst.msk [vmem:[%s949_s5] sm:$0xff] %vm607_vm5, %v584_v3 }
 0x15a   : > { %v594_v4 = vpop.permute.xlu1 %593 }
 0x15b   : > { %613 = vst.msk [vmem:[%s949_s5 + $0x50] sm:$0xff] %vm607_vm5, %v594_v4 }
 0x15c   : > { %v592_v5 = vpop.permute.xlu0 %591 }
 0x15d   : > { %612 = vst.msk [vmem:[%s949_s5 + $0x40] sm:$0xff] %vm607_vm5, %v592_v5 }
 0x15e   : > { %v557_v6 = vpop.permute.xlu1 %556 }
 0x15f   : > { %578 = vst.msk [vmem:[%s949_s5 + $0x30] sm:$0xff] %vm574_vm4, %v557_v6 }
 0x160   : > { %v555_v7 = vpop.permute.xlu0 %554 }
 0x161   : > { %577 = vst.msk [vmem:[%s949_s5 + $0x20] sm:$0xff] %vm574_vm4, %v555_v7 }
 0x162   : > { %v565_v8 = vpop.permute.xlu1 %564 }
 0x163   : > { %582 = vst.msk [vmem:[%s949_s5 + $0x70] sm:$0xff] %vm574_vm4, %v565_v8 }
 0x164   : > { %v563_v9 = vpop.permute.xlu0 %562 }
 0x165   : > { %581 = vst.msk [vmem:[%s949_s5 + $0x60] sm:$0xff] %vm574_vm4, %v563_v9 }
 0x166   : > { %v623_v10 = vpop.permute.xlu1 %622 }
 0x167   : > { %795 = vst.msk [vmem:[%s949_s5 + $0x38] sm:$0xff] %vm574_vm4, %v623_v10 }
 0x168   : > { %803 = vst.msk [vmem:[%s949_s5 + $0x38] sm:$0xff] %vm607_vm5, %v405_v51  ;;  %v621_v11 = vpop.permute.xlu0 %620 }
 0x169   : > { %794 = vst.msk [vmem:[%s949_s5 + $0x28] sm:$0xff] %vm574_vm4, %v621_v11 }
 0x16a   : > { %802 = vst.msk [vmem:[%s949_s5 + $0x28] sm:$0xff] %vm607_vm5, %v400_v54  ;;  %v631_v12 = vpop.permute.xlu1 %630 }
 0x16b   : > { %799 = vst.msk [vmem:[%s949_s5 + $0x78] sm:$0xff] %vm574_vm4, %v631_v12 }
 0x16c   : > { %807 = vst.msk [vmem:[%s949_s5 + $0x78] sm:$0xff] %vm607_vm5, %v425_v55  ;;  %v629_v13 = vpop.permute.xlu0 %628 }
 0x16d   : > { %798 = vst.msk [vmem:[%s949_s5 + $0x68] sm:$0xff] %vm574_vm4, %v629_v13 }
 0x16e   : > { %806 = vst.msk [vmem:[%s949_s5 + $0x68] sm:$0xff] %vm607_vm5, %v420_v57  ;;  %v590_v14 = vpop.permute.xlu1 %589 }
 0x16f   : > { %611 = vst.msk [vmem:[%s949_s5 + $0x30] sm:$0xff] %vm607_vm5, %v590_v14 }
 0x170   : > { %v588_v15 = vpop.permute.xlu0 %587 }
 0x171   : > { %610 = vst.msk [vmem:[%s949_s5 + $0x20] sm:$0xff] %vm607_vm5, %v588_v15 }
 0x172   : > { %v598_v16 = vpop.permute.xlu1 %597 }
 0x173   : > { %615 = vst.msk [vmem:[%s949_s5 + $0x70] sm:$0xff] %vm607_vm5, %v598_v16 }
 0x174   : > { %v596_v17 = vpop.permute.xlu0 %595 }
 0x175   : > { %614 = vst.msk [vmem:[%s949_s5 + $0x60] sm:$0xff] %vm607_vm5, %v596_v17 }
 0x176 PF: > { %s14_s17 = sadd.s32 1, %s887_s17   ;;  %s1144_s15 = smov %s883_s16 }
 0x177   : > { %p11_p5 = scmp.ge.s32.totalorder %s14_s17, 4   ;;  %s1145_s16 = smov %s1147_s18 }
 0x179   :  { %13 = sbr.rel (!%p11_p5) target bundleno = 2 (0x2), region = 70 }

</bundles_post_ra>
